<compile_context>
chip_gen: v7x
topology: tpu7x:2x2x1
jax: 0.10.0
libtpu: 0.0.40
codegen_flags: <defaults>
</compile_context>

<pallas_src>
import jax
import jax.numpy as jnp
from jax.experimental import pallas as pl
from jax.experimental.pallas import tpu as pltpu


def _round_up(x, m):
    return ((x + m - 1) // m) * m


# dot_general dimension numbers for A @ B.T (contract last dim of both).
_NT_DIMS = (((1,), (1,)), ((), ()))


def edge_decoder_kernel(zu_ref, zm_ref, w1u_ref, w1m_ref, b1_ref, w2_ref,
                        b2_ref, o_ref):
    # zu_ref:  (TE, H)  gathered user embeddings, edge-major (gather layout)
    # zm_ref:  (TE, H)  gathered movie embeddings, edge-major
    # w1u_ref: (H, H)   lin1.weight[:, :H]  (out_features, in_features)
    # w1m_ref: (H, H)   lin1.weight[:, H:]
    # b1_ref:  (H, 1)   lin1.bias (f32)
    # w2_ref:  (1, H)   lin2.weight
    # b2_ref:  (1, 1)   lin2.bias (SMEM scalar, f32)
    # o_ref:   (1, TE)  lane-dense output block
    #
    # h = W1u @ zu.T + W1m @ zm.T  -> feature-major (H, TE); the layout flip is
    # folded into the A @ B.T contraction, so no wrapper transpose is needed.
    h = jax.lax.dot_general(w1u_ref[...], zu_ref[...], _NT_DIMS,
                            preferred_element_type=jnp.float32)
    h += jax.lax.dot_general(w1m_ref[...], zm_ref[...], _NT_DIMS,
                             preferred_element_type=jnp.float32)
    h = jnp.maximum(h + b1_ref[...], 0.0)                        # (H, TE) f32
    out = jnp.dot(w2_ref[...], h.astype(w2_ref.dtype),
                  preferred_element_type=jnp.float32)             # (1, TE)
    o_ref[...] = (out + b2_ref[0, 0]).astype(o_ref.dtype)


def edge_decoder(z_user, z_movie, edge_label_index, w1, b1, w2, b2,
                 *, block_e=32768, compute_dtype=jnp.bfloat16):
    """Pallas implementation of EdgeDecoder.forward.

    z_user:  (num_users, H) float32
    z_movie: (num_movies, H) float32
    edge_label_index: (2, E) int  -- [row (user idx), col (movie idx)]
    w1: (H, 2H) PyTorch-layout lin1.weight ; b1: (H,)
    w2: (1, H)  PyTorch-layout lin2.weight ; b2: (1,)
    returns: (E,) float32
    """
    H = z_user.shape[1]
    row = edge_label_index[0].astype(jnp.int32)
    col = edge_label_index[1].astype(jnp.int32)
    E = int(row.shape[0])

    if E == 0:  # guard: empty edge set
        return jnp.zeros((0,), jnp.float32)

    # Edge-tile size: multiple of 128 (lane dim), bounded by block_e, shrunk
    # so the grid keeps >= 2 tiles (both v7x TensorCores get work).
    E_min = _round_up(E, 128)
    TE = _round_up(min(int(block_e), E_min), 128)
    if E_min > 128:
        TE = min(TE, _round_up(pl.cdiv(E_min, 2), 128))
    E_pad = _round_up(E, TE)
    grid = (E_pad // TE,)

    # Pad the index vectors (index 0 is always valid); padded lanes are
    # sliced off after the kernel.
    if E_pad != E:
        row = jnp.pad(row, (0, E_pad - E))
        col = jnp.pad(col, (0, E_pad - E))

    # Gather (data-dependent) stays in XLA; its natural edge-major output is
    # consumed directly by the kernel (no wrapper-side transpose/relayout).
    # TODO(synk): fuse the gather via PrefetchScalarGridSpec when the
    # embedding tables are known to fit in VMEM.
    zu = z_user.astype(compute_dtype)[row]                      # (E_pad, H)
    zm = z_movie.astype(compute_dtype)[col]                     # (E_pad, H)

    # Split lin1 so the (E, 2H) concat buffer is never materialized.
    w1 = jnp.asarray(w1, jnp.float32)
    w1u = w1[:, :H].astype(compute_dtype)                       # (H, H)
    w1m = w1[:, H:].astype(compute_dtype)                       # (H, H)
    b1_c = jnp.asarray(b1, jnp.float32).reshape(H, 1)           # (H, 1)
    w2_r = jnp.asarray(w2, jnp.float32).reshape(1, H).astype(compute_dtype)
    b2_s = jnp.asarray(b2, jnp.float32).reshape(1, 1)           # SMEM scalar

    itemsize = jnp.dtype(compute_dtype).itemsize
    cost = pl.CostEstimate(
        flops=2 * E_pad * (2 * H * H + H),
        transcendentals=0,
        bytes_accessed=(2 * E_pad * H * itemsize      # embedding tiles in
                        + E_pad * 4                   # f32 output
                        + (2 * H * H + H) * itemsize  # lin1/lin2 weights
                        + (H + 1) * 4),               # biases
    )

    out = pl.pallas_call(
        edge_decoder_kernel,
        out_shape=jax.ShapeDtypeStruct((1, E_pad), jnp.float32),
        grid=grid,
        in_specs=[
            pl.BlockSpec((TE, H), lambda i: (i, 0)),            # user emb tile
            pl.BlockSpec((TE, H), lambda i: (i, 0)),            # movie emb tile
            pl.BlockSpec((H, H), lambda i: (0, 0)),             # w1 (user half)
            pl.BlockSpec((H, H), lambda i: (0, 0)),             # w1 (movie half)
            pl.BlockSpec((H, 1), lambda i: (0, 0)),             # b1
            pl.BlockSpec((1, H), lambda i: (0, 0)),             # w2
            pl.BlockSpec(memory_space=pltpu.MemorySpace.SMEM),  # b2 scalar
        ],
        out_specs=pl.BlockSpec((1, TE), lambda i: (0, i)),
        compiler_params=pltpu.CompilerParams(
            dimension_semantics=("parallel",),
            vmem_limit_bytes=48 * 1024 * 1024,
        ),
        cost_estimate=cost,
    )(zu, zm, w1u, w1m, b1_c, w2_r, b2_s)

    return out.reshape(-1)[:E]


def _reference(z_user, z_movie, edge_label_index, w1, b1, w2, b2):
    row = edge_label_index[0]
    col = edge_label_index[1]
    z = jnp.concatenate([z_user[row], z_movie[col]], axis=-1)
    z = jnp.maximum(z @ w1.T + b1, 0.0)
    z = z @ w2.T + b2
    return z.reshape(-1)


if __name__ == "__main__":
    key = jax.random.PRNGKey(0)
    k_u, k_m, k_row, k_col, k_w1, k_b1, k_w2, k_b2 = jax.random.split(key, 8)

    hidden = 32
    num_users = 6
    num_movies = 10
    num_edges = 300  # not a multiple of 128 -> exercises padding + multi-tile grid

    z_user = jax.random.normal(k_u, (num_users, hidden), dtype=jnp.float32)
    z_movie = jax.random.normal(k_m, (num_movies, hidden), dtype=jnp.float32)
    row = jax.random.randint(k_row, (num_edges,), 0, num_users, dtype=jnp.int32)
    col = jax.random.randint(k_col, (num_edges,), 0, num_movies, dtype=jnp.int32)
    edge_label_index = jnp.stack([row, col], axis=0)  # (2, E)

    # Deterministic parameter init (shapes match torch.nn.Linear in __init__).
    bound1 = 1.0 / jnp.sqrt(2.0 * hidden)
    w1 = jax.random.uniform(k_w1, (hidden, 2 * hidden), jnp.float32, -bound1, bound1)
    b1 = jax.random.uniform(k_b1, (hidden,), jnp.float32, -bound1, bound1)
    bound2 = 1.0 / jnp.sqrt(float(hidden))
    w2 = jax.random.uniform(k_w2, (1, hidden), jnp.float32, -bound2, bound2)
    b2 = jax.random.uniform(k_b2, (1,), jnp.float32, -bound2, bound2)

    ref = _reference(z_user, z_movie, edge_label_index, w1, b1, w2, b2)

    # f32 path with a small tile: bit-faithful to the PyTorch module and
    # exercises the 3-tile grid (E_pad=384, TE=128).
    out_f32 = edge_decoder(z_user, z_movie, edge_label_index, w1, b1, w2, b2,
                           block_e=128, compute_dtype=jnp.float32)
    out_f32 = jax.block_until_ready(out_f32)
    assert out_f32.shape == (num_edges,)
    assert jnp.allclose(out_f32, ref, atol=1e-5, rtol=1e-5), "f32 mismatch"

    # Default path (bf16, large tile capped by the >=2-tiles guard -> TE=256,
    # 2-tile grid): accuracy/speed knob documented in edge_decoder().
    out_bf16 = edge_decoder(z_user, z_movie, edge_label_index, w1, b1, w2, b2)
    out_bf16 = jax.block_until_ready(out_bf16)
    assert out_bf16.shape == (num_edges,)
    assert jnp.allclose(out_bf16, ref, atol=1e-1, rtol=5e-2), "bf16 mismatch"

    print("KERNEL_OK")
</pallas_src>

<mosaic_0001>
module attributes {stable_mosaic.version = 11 : i64} {
  func.func @edge_decoder_kernel(%arg0: i32, %arg1: memref<128x32xf32, #tpu.memory_space<vmem>>, %arg2: memref<128x32xf32, #tpu.memory_space<vmem>>, %arg3: memref<32x32xf32, #tpu.memory_space<vmem>>, %arg4: memref<32x32xf32, #tpu.memory_space<vmem>>, %arg5: memref<32x1xf32, #tpu.memory_space<vmem>>, %arg6: memref<1x32xf32, #tpu.memory_space<vmem>>, %arg7: memref<1x1xf32, #tpu.memory_space<smem>>, %arg8: memref<1x128xf32, #tpu.memory_space<vmem>>) attributes {dimension_semantics = [#tpu.dimension_semantics<parallel>], iteration_bounds = array<i64: 3>, scalar_prefetch = 0 : i64, scratch_operands = 0 : i64, tpu.core_type = #tpu.core_type<tc>, window_params = [{transform_indices = @transform_0, window_bounds = array<i64: 128, 32>}, {transform_indices = @transform_1, window_bounds = array<i64: 128, 32>}, {pipeline_mode = #tpu.pipeline_mode<synchronous>, transform_indices = @transform_2, window_bounds = array<i64: 32, 32>}, {pipeline_mode = #tpu.pipeline_mode<synchronous>, transform_indices = @transform_3, window_bounds = array<i64: 32, 32>}, {pipeline_mode = #tpu.pipeline_mode<synchronous>, transform_indices = @transform_4, window_bounds = array<i64: 32, 1>}, {pipeline_mode = #tpu.pipeline_mode<synchronous>, transform_indices = @transform_5, window_bounds = array<i64: 1, 32>}, {transform_indices = @transform_6, window_bounds = array<i64: 1, 1>}, {transform_indices = @transform_7, window_bounds = array<i64: 1, 128>}]} {
    %c0 = arith.constant 0 : index
    %c0_0 = arith.constant 0 : index
    %0 = vector.load %arg3[%c0, %c0_0] : memref<32x32xf32, #tpu.memory_space<vmem>>, vector<32x32xf32>
    %c0_1 = arith.constant 0 : index
    %c0_2 = arith.constant 0 : index
    %1 = vector.load %arg1[%c0_1, %c0_2] : memref<128x32xf32, #tpu.memory_space<vmem>>, vector<128x32xf32>
    %cst = arith.constant dense<0.000000e+00> : vector<32x128xf32>
    %2 = tpu.matmul %0, %1, %cst {dimension_numbers = #tpu.dot_dimension_numbers<[1], [1], [0], [0], [0, 0, 1, 0], [], []>} : vector<32x32xf32>, vector<128x32xf32>, vector<32x128xf32> -> vector<32x128xf32>
    %c0_3 = arith.constant 0 : index
    %c0_4 = arith.constant 0 : index
    %3 = vector.load %arg4[%c0_3, %c0_4] : memref<32x32xf32, #tpu.memory_space<vmem>>, vector<32x32xf32>
    %c0_5 = arith.constant 0 : index
    %c0_6 = arith.constant 0 : index
    %4 = vector.load %arg2[%c0_5, %c0_6] : memref<128x32xf32, #tpu.memory_space<vmem>>, vector<128x32xf32>
    %cst_7 = arith.constant dense<0.000000e+00> : vector<32x128xf32>
    %5 = tpu.matmul %3, %4, %cst_7 {dimension_numbers = #tpu.dot_dimension_numbers<[1], [1], [0], [0], [0, 0, 1, 0], [], []>} : vector<32x32xf32>, vector<128x32xf32>, vector<32x128xf32> -> vector<32x128xf32>
    %6 = arith.addf %2, %5 : vector<32x128xf32>
    %c0_8 = arith.constant 0 : index
    %c0_9 = arith.constant 0 : index
    %7 = vector.load %arg5[%c0_8, %c0_9] : memref<32x1xf32, #tpu.memory_space<vmem>>, vector<32x1xf32>
    %8 = vector.broadcast %7 : vector<32x1xf32> to vector<32x128xf32>
    %9 = arith.addf %6, %8 : vector<32x128xf32>
    %cst_10 = arith.constant 0.000000e+00 : f32
    %10 = vector.broadcast %cst_10 : f32 to vector<32x128xf32>
    %11 = arith.maximumf %9, %10 : vector<32x128xf32>
    %c0_11 = arith.constant 0 : index
    %c0_12 = arith.constant 0 : index
    %12 = vector.load %arg6[%c0_11, %c0_12] : memref<1x32xf32, #tpu.memory_space<vmem>>, vector<1x32xf32>
    %cst_13 = arith.constant dense<0.000000e+00> : vector<1x128xf32>
    %13 = tpu.matmul %12, %11, %cst_13 {dimension_numbers = #tpu.dot_dimension_numbers<[1], [0], [0], [1], [0, 0, 1, 1], [], []>} : vector<1x32xf32>, vector<32x128xf32>, vector<1x128xf32> -> vector<1x128xf32>
    %c0_14 = arith.constant 0 : index
    %c0_15 = arith.constant 0 : index
    %14 = memref.load %arg7[%c0_14, %c0_15] : memref<1x1xf32, #tpu.memory_space<smem>>
    %15 = vector.broadcast %14 : f32 to vector<1x128xf32>
    %16 = arith.addf %13, %15 : vector<1x128xf32>
    %c0_16 = arith.constant 0 : index
    %c0_17 = arith.constant 0 : index
    %17 = vector.load %arg8[%c0_16, %c0_17] : memref<1x128xf32, #tpu.memory_space<vmem>>, vector<1x128xf32>
    tpu.vector_store %arg8[%c0_16, %c0_17], %16 {strides = array<i32>} : memref<1x128xf32, #tpu.memory_space<vmem>>, vector<1x128xf32>,
    return
  }
  func.func @transform_0(%arg0: i32) -> (i32, i32) {
    %c0_i32 = arith.constant 0 : i32
    %c0_i32_0 = arith.constant 0 : i32
    return %arg0, %c0_i32 : i32, i32
  }
  func.func @transform_1(%arg0: i32) -> (i32, i32) {
    %c0_i32 = arith.constant 0 : i32
    %c0_i32_0 = arith.constant 0 : i32
    return %arg0, %c0_i32 : i32, i32
  }
  func.func @transform_2(%arg0: i32) -> (i32, i32) {
    %c0_i32 = arith.constant 0 : i32
    %c0_i32_0 = arith.constant 0 : i32
    %c0_i32_1 = arith.constant 0 : i32
    return %c0_i32, %c0_i32_0 : i32, i32
  }
  func.func @transform_3(%arg0: i32) -> (i32, i32) {
    %c0_i32 = arith.constant 0 : i32
    %c0_i32_0 = arith.constant 0 : i32
    %c0_i32_1 = arith.constant 0 : i32
    return %c0_i32, %c0_i32_0 : i32, i32
  }
  func.func @transform_4(%arg0: i32) -> (i32, i32) {
    %c0_i32 = arith.constant 0 : i32
    %c0_i32_0 = arith.constant 0 : i32
    %c0_i32_1 = arith.constant 0 : i32
    return %c0_i32, %c0_i32_0 : i32, i32
  }
  func.func @transform_5(%arg0: i32) -> (i32, i32) {
    %c0_i32 = arith.constant 0 : i32
    %c0_i32_0 = arith.constant 0 : i32
    %c0_i32_1 = arith.constant 0 : i32
    return %c0_i32, %c0_i32_0 : i32, i32
  }
  func.func @transform_6(%arg0: i32) -> (i32, i32) {
    %c0_i32 = arith.constant 0 : i32
    %c0_i32_0 = arith.constant 0 : i32
    %c0_i32_1 = arith.constant 0 : i32
    return %c0_i32, %c0_i32_0 : i32, i32
  }
  func.func @transform_7(%arg0: i32) -> (i32, i32) {
    %c0_i32 = arith.constant 0 : i32
    %c0_i32_0 = arith.constant 0 : i32
    return %c0_i32, %arg0 : i32, i32
  }
}

</mosaic_0001>

<bundles_post_ra>
// kernel: tpu_custom_call.1
= control target key start
LH: loop header
LB: loop body
LE: loop exit
PB: predicated region body
PF: predicated region fallthrough
CT: control target
= control target key end

     0   :  { %s1524_s0 = inlined_call_operand.vmem [shape: f32[384,32], index: 0, kind: input, shape index: {}]   ;;  %s1525_s1 = inlined_call_operand.vmem [shape: f32[384,32], index: 1, kind: input, shape index: {}]   ;;  %s1526_s2 = inlined_call_operand.vmem [shape: f32[32,32], index: 2, kind: input, shape index: {}]   ;;  %s1527_s3 = inlined_call_operand.vmem [shape: f32[32,32], index: 3, kind: input, shape index: {}]   ;;  %s1528_s4 = inlined_call_operand.vmem [shape: f32[32,1], index: 4, kind: input, shape index: {}]   ;;  %s1529_s5 = inlined_call_operand.vmem [shape: f32[1,32], index: 5, kind: input, shape index: {}]   ;;  %s1530_s6 = inlined_call_operand.<no memory space> [shape: f32[1,1], index: 6, kind: input, shape index: {}]   ;;  %s1531_s7 = inlined_call_operand.hbm [shape: f32[1,384], index: 7, kind: output, shape index: {}]  }
   0x1   :  { %12 = sst [smem:[#allocation2]] %s1530_s6 }
   0x2   :  { %13 = vsyncpa [#allocation4], 0 }
   0x3   :  { %15 = vsyncpa [#allocation4 + $0x1], 0  ;;  %s1268_s26 = smov 0   ;;  %s1270_s27 = smov 0  }
   0x4   :  { %s1272_s28 = smov 0   ;;  %s1274_s29 = smov 0  }
   0x5 LB: > { %s820_s6 = sadd.s32 4294967295, %s1218_s29   ;;  %s821_s30 = sadd.s32 4294967294, %s1218_s29   ;;  %s1218_s29 = sphi %s1274_s29, %s1539_s29   ;;  %s1214_s28 = sphi %s1272_s28, %s1538_s28   ;;  %s1210_s27 = sphi %s1270_s27, %s1537_s27   ;;  %s1206_s26 = sphi %s1268_s26, %s1536_s26  }
   0x6   : > { %s1291_s8 = sadd.s32 1, %s1218_s29   ;;  %s185_s9 = sadd.s32 1, %s1214_s28 }
   0x7   : > { %s182_s10 = ssub.s32 %s1218_s29, %s1291_s8  ;;  %p195_p0 = scmp.ne.s32.totalorder %s1214_s28, %s1210_s27 }
   0x8   : > { %p183_p1 = scmp.eq.s32.totalorder %s182_s10, 0  ;;  %p196_p2 = scmp.eq.s32.totalorder %s820_s6, 2 }
   0x9   : > { %p201_p3 = scmp.ne.s32.totalorder %s1210_s27, %s1206_s26  ;;  %p202_p4 = scmp.eq.s32.totalorder %s821_s30, 2 }
   0xa   : > { %s1301_s11 = scalar_select %p183_p1, %s1214_s28, %s185_s9  }
   0xb   : > { %p1303_p5 = por %p196_p2, %p195_p0  ;;  %p1307_p6 = por %p202_p4, %p201_p3 }
   0xc   : > { %p824_p7 = scmp.ge.s32.totalorder %s1218_s29, 1  ;;  %p253_p8 = scmp.lt.s32.totalorder %s1218_s29, 4 }
   0xe   : > { %p254_p9 = pnand %p824_p7, %p253_p8 }
   0xf   : > { %s1313_s14 = sshll.u32 (!%p254_p9), %s820_s6, 4  ;;  %vm341_vm0 = vcmask (!%p254_p9), 261120   ;;  %v321_v0 = vld [vmem:[%s1527_s3] sm:$0xff] (!%p254_p9)  ;;  %v1220_v2 = vmov (!%p254_p9), 0   ;;  %v634_v4 = vld [vmem:[%s1528_s4 + $0x10] sm:$0xff] (!%p254_p9)  ;;  %v633_v5 = vld [vmem:[%s1528_s4 + $0x8] sm:$0xff] (!%p254_p9) }
  0x10   : > { %257 = sbr.rel (%p254_p9) target bundleno = 551 (0x227), region = 48  ;;  %v301_v1 = vld [vmem:[%s1526_s2] sm:$0xff] (!%p254_p9)  ;;  %p290_p10 = scmp.lt.s32.totalorder (!%p254_p9), %s1313_s14, 47  ;;  %950 = vmatprep.mubr.msk.f32.mxu1 (!%p254_p9), %vm341_vm0, %v321_v0  ;;  %1154 = vset.pattern.permute.xlu0 (!%p254_p9), %v1220_v2  ;;  %v635_v6 = vld [vmem:[%s1528_s4 + $0x18] sm:$0xff] (!%p254_p9)  ;;  %vm1344_vm1 = vmpackc.low (!%p254_p9), %vm341_vm0, %vm341_vm0  ;;  %v1221_v62 = vmov (!%p254_p9), 0.0|0.0   ;;  %vm1222_vm2 = vmmov (!%p254_p9), 0  }
  0x11   : > { %988 = vmatprep.mubr.msk.f32.mxu0 (!%p254_p9), %vm341_vm0, %v301_v1  ;;  %1155 = vset.pattern.permute.xlu1 (!%p254_p9), %v1220_v2  ;;  %v632_v3 = vld [vmem:[%s1528_s4] sm:$0xff] (!%p254_p9)  ;;  %v322_v56 = vld [vmem:[%s1527_s3 + $0x8] sm:$0xff] (!%p254_p9)  ;;  %v323_v58 = vld [vmem:[%s1527_s3 + $0x10] sm:$0xff] (!%p254_p9)  ;;  %v1223_v63 = vmov (!%p254_p9), 0.0   ;;  %s287_s20 = sand.u32 (!%p254_p9), 1, %s1210_s27   ;;  %s1482_s25 = scalar_lea.hbm (!%p254_p9), %s1531_s7, %s1313_s14 }
  0x12   : > { %638 = vperm.xlu0 (!%p254_p9), %1154, %v632_v3   ;;  %648 = vperm.xlu1 (!%p254_p9), %1155, %v634_v4   ;;  %v302_v57 = vld [vmem:[%s1526_s2 + $0x8] sm:$0xff] (!%p254_p9)  ;;  %v303_v59 = vld [vmem:[%s1526_s2 + $0x10] sm:$0xff] (!%p254_p9)  ;;  %v324_v60 = vld [vmem:[%s1527_s3 + $0x18] sm:$0xff] (!%p254_p9)  ;;  %s288_s21 = scalar_lea.vmem (!%p254_p9), [#allocation3], %s287_s20  ;;  %s742_s6 = scalar_lea.sflag (!%p254_p9), [#allocation4], %s287_s20 }
  0x13   : > { %v304_v61 = vld [vmem:[%s1526_s2 + $0x18] sm:$0xff] (!%p254_p9)  ;;  %s754_s22 = sshll.u32 (!%p254_p9), %s288_s21, 4  ;;  %s1224_s9 = smov (!%p254_p9), [#allocation3]   ;;  %s1484_s22 = int_to_ptr.vmem [resolvable:$true] %s754_s22 }
  0x14   : > { %s1156_s30 = scalar_lea.vmem (!%p254_p9), %s1484_s22, 16  ;;  %s1160_s10 = sshll.u32 (!%p254_p9), %s1224_s9, 4  ;;  %s1161_s10 = int_to_ptr.vmem [resolvable:$false] %s1160_s10 }
  0x15   : > { %p1157_p11 = scmp.ne.s32.totalorder (!%p254_p9), %s1484_s22, %s1156_s30  ;;  %s1162_s15 = scalar_lea.vmem (!%p254_p9), %s1161_s10, 32 }
  0x16   : > { %643 = vperm.xlu0 (!%p254_p9), %1154, %v633_v5   ;;  %653 = vperm.xlu1 (!%p254_p9), %1155, %v635_v6   ;;  %p1163_p0 = scmp.lt.s32.totalorder (!%p254_p9), %s1484_s22, %s1161_s10  ;;  %p1164_p1 = scmp.lt.s32.totalorder (!%p254_p9), %s1162_s15, %s1156_s30 }
  0x17   : > { %s291_s19 = scalar_select %p290_p10, %s1313_s14, 47 }
  0x18   : > { %p1158_p12 = pnand %p1157_p11, %p1303_p5  ;;  %p1165_p2 = por %p1164_p1, %p1163_p0 }
  0x19   : > { %s826_s24 = sshll.u32 %s291_s19, 3 }
  0x1a   : > { %s1340_s16 = scalar_lea.vmem %s1525_s1, %s826_s24  ;;  %s1351_s19 = scalar_lea.vmem %s1524_s0, %s826_s24 }
  0x1b   : > { %v325_v8 = vld [vmem:[%s1340_s16] sm:$0xff]  ;;  %v326_v9 = vld [vmem:[%s1340_s16 + $0x8] sm:$0xff]  ;;  %v327_v13 = vld [vmem:[%s1340_s16 + $0x10] sm:$0xff]  ;;  %p1159_p13 = pneg %p1158_p12 }
  0x1c   : > { %v305_v10 = vld [vmem:[%s1351_s19] sm:$0xff]  ;;  %v1005_v11 = vpack.c.bf16 %v326_v9, %v325_v8  ;;  %v306_v12 = vld [vmem:[%s1351_s19 + $0x8] sm:$0xff]  ;;  %v328_v14 = vld [vmem:[%s1340_s16 + $0x18] sm:$0xff] }
  0x1d   : > { %v1053_v15 = vpack.c.bf16 %v306_v12, %v305_v10  ;;  %v1011_v16 = vpack.c.bf16 %v328_v14, %v327_v13  ;;  %v307_v17 = vld [vmem:[%s1351_s19 + $0x10] sm:$0xff]  ;;  %v308_v18 = vld [vmem:[%s1351_s19 + $0x18] sm:$0xff]  ;;  %v329_v20 = vld [vmem:[%s1340_s16 + $0x20] sm:$0xff]  ;;  %p1166_p3 = pnand %p1165_p2, %p1159_p13 }
  0x1e   : > { %1007 = vmatprep.subr.msk.bf16.mxu1 %vm1344_vm1, %v1005_v11  ;;  %v1059_v19 = vpack.c.bf16 %v308_v18, %v307_v17  ;;  %v330_v21 = vld [vmem:[%s1340_s16 + $0x28] sm:$0xff]  ;;  %v309_v22 = vld [vmem:[%s1351_s19 + $0x20] sm:$0xff]  ;;  %v331_v26 = vld [vmem:[%s1340_s16 + $0x30] sm:$0xff] }
  0x1f   : > { %1055 = vmatprep.subr.msk.bf16.mxu0 %vm1344_vm1, %v1053_v15  ;;  %1010 = vmatpush3.bf16.xpose.msk.msra.mxu1 %vm1344_vm1, %v1005_v11  ;;  %v310_v23 = vld [vmem:[%s1351_s19 + $0x28] sm:$0xff]  ;;  %v1017_v24 = vpack.c.bf16 %v330_v21, %v329_v20  ;;  %v332_v27 = vld [vmem:[%s1340_s16 + $0x38] sm:$0xff]  ;;  %v311_v28 = vld [vmem:[%s1351_s19 + $0x30] sm:$0xff] }
  0x20   : > { %1058 = vmatpush3.bf16.xpose.msk.msra.mxu0 %vm1344_vm1, %v1053_v15  ;;  %1013 = vmatprep.subr.msk.bf16.mxu1 %vm1344_vm1, %v1011_v16  ;;  %v1065_v25 = vpack.c.bf16 %v310_v23, %v309_v22  ;;  %v312_v29 = vld [vmem:[%s1351_s19 + $0x38] sm:$0xff]  ;;  %v1023_v30 = vpack.c.bf16 %v332_v27, %v331_v26  ;;  %v333_v32 = vld [vmem:[%s1340_s16 + $0x40] sm:$0xff]  ;;  %v334_v33 = vld [vmem:[%s1340_s16 + $0x48] sm:$0xff] }
  0x21   : > { %1061 = vmatprep.subr.msk.bf16.mxu0 %vm1344_vm1, %v1059_v19  ;;  %v1071_v31 = vpack.c.bf16 %v312_v29, %v311_v28  ;;  %v313_v34 = vld [vmem:[%s1351_s19 + $0x40] sm:$0xff]  ;;  %v314_v35 = vld [vmem:[%s1351_s19 + $0x48] sm:$0xff]  ;;  %v1029_v36 = vpack.c.bf16 %v334_v33, %v333_v32  ;;  %v335_v38 = vld [vmem:[%s1340_s16 + $0x50] sm:$0xff] }
  0x22   : > { %v1077_v37 = vpack.c.bf16 %v314_v35, %v313_v34  ;;  %v336_v39 = vld [vmem:[%s1340_s16 + $0x58] sm:$0xff]  ;;  %v315_v40 = vld [vmem:[%s1351_s19 + $0x50] sm:$0xff]  ;;  %v337_v44 = vld [vmem:[%s1340_s16 + $0x60] sm:$0xff] }
  0x23   : > { %v316_v41 = vld [vmem:[%s1351_s19 + $0x58] sm:$0xff]  ;;  %v1035_v42 = vpack.c.bf16 %v336_v39, %v335_v38  ;;  %v338_v45 = vld [vmem:[%s1340_s16 + $0x68] sm:$0xff]  ;;  %v317_v46 = vld [vmem:[%s1351_s19 + $0x60] sm:$0xff] }
  0x24   : > { %v1083_v43 = vpack.c.bf16 %v316_v41, %v315_v40  ;;  %v318_v47 = vld [vmem:[%s1351_s19 + $0x68] sm:$0xff]  ;;  %v1041_v48 = vpack.c.bf16 %v338_v45, %v337_v44  ;;  %v339_v50 = vld [vmem:[%s1340_s16 + $0x70] sm:$0xff]  ;;  %v340_v51 = vld [vmem:[%s1340_s16 + $0x78] sm:$0xff] }
  0x25   : > { %v1089_v49 = vpack.c.bf16 %v318_v47, %v317_v46  ;;  %v319_v52 = vld [vmem:[%s1351_s19 + $0x70] sm:$0xff]  ;;  %v320_v53 = vld [vmem:[%s1351_s19 + $0x78] sm:$0xff]  ;;  %v1047_v54 = vpack.c.bf16 %v340_v51, %v339_v50  ;;  %v664_v26 = vld [vmem:[%s1529_s5] sm:$0x1]  ;;  %s665_s19 = sld [smem:[#allocation2]] }
  0x26   : > { %v1095_v55 = vpack.c.bf16 %v320_v53, %v319_v52 }
  0x27   : > { %1016 = vmatpush3.bf16.xpose.msk.msra.mxu1 %vm1344_vm1, %v1011_v16 }
  0x28   : > { %1064 = vmatpush3.bf16.xpose.msk.msra.mxu0 %vm1344_vm1, %v1059_v19  ;;  %1019 = vmatprep.subr.msk.bf16.mxu1 %vm1344_vm1, %v1017_v24 }
  0x29   : > { %1067 = vmatprep.subr.msk.bf16.mxu0 %vm1344_vm1, %v1065_v25 }
  0x2b   : > { %v666_v27 = vstv %s665_s19 }
  0x2f   : > { %1022 = vmatpush3.bf16.xpose.msk.msra.mxu1 %vm1344_vm1, %v1017_v24 }
  0x30   : > { %1070 = vmatpush3.bf16.xpose.msk.msra.mxu0 %vm1344_vm1, %v1065_v25  ;;  %1025 = vmatprep.subr.msk.bf16.mxu1 %vm1344_vm1, %v1023_v30 }
  0x31   : > { %1073 = vmatprep.subr.msk.bf16.mxu0 %vm1344_vm1, %v1071_v31 }
  0x37   : > { %1028 = vmatpush3.bf16.xpose.msk.msra.mxu1 %vm1344_vm1, %v1023_v30 }
  0x38   : > { %1076 = vmatpush3.bf16.xpose.msk.msra.mxu0 %vm1344_vm1, %v1071_v31  ;;  %1031 = vmatprep.subr.msk.bf16.mxu1 %vm1344_vm1, %v1029_v36 }
  0x39   : > { %1079 = vmatprep.subr.msk.bf16.mxu0 %vm1344_vm1, %v1077_v37 }
  0x3f   : > { %1034 = vmatpush3.bf16.xpose.msk.msra.mxu1 %vm1344_vm1, %v1029_v36 }
  0x40   : > { %1082 = vmatpush3.bf16.xpose.msk.msra.mxu0 %vm1344_vm1, %v1077_v37  ;;  %1037 = vmatprep.subr.msk.bf16.mxu1 %vm1344_vm1, %v1035_v42 }
  0x41   : > { %1085 = vmatprep.subr.msk.bf16.mxu0 %vm1344_vm1, %v1083_v43 }
  0x47   : > { %1040 = vmatpush3.bf16.xpose.msk.msra.mxu1 %vm1344_vm1, %v1035_v42 }
  0x48   : > { %1088 = vmatpush3.bf16.xpose.msk.msra.mxu0 %vm1344_vm1, %v1083_v43  ;;  %1043 = vmatprep.subr.msk.bf16.mxu1 %vm1344_vm1, %v1041_v48 }
  0x49   : > { %1091 = vmatprep.subr.msk.bf16.mxu0 %vm1344_vm1, %v1089_v49 }
  0x4f   : > { %1046 = vmatpush3.bf16.xpose.msk.msra.mxu1 %vm1344_vm1, %v1041_v48 }
  0x50   : > { %1094 = vmatpush3.bf16.xpose.msk.msra.mxu0 %vm1344_vm1, %v1089_v49  ;;  %1049 = vmatprep.subr.msk.bf16.mxu1 %vm1344_vm1, %v1047_v54 }
  0x51   : > { %1097 = vmatprep.subr.msk.bf16.mxu0 %vm1344_vm1, %v1095_v55 }
  0x57   : > { %1052 = vmatpush3.bf16.xpose.msk.msra.mxu1 %vm1344_vm1, %v1047_v54 }
  0x58   : > { %1100 = vmatpush3.bf16.xpose.msk.msra.mxu0 %vm1344_vm1, %v1095_v55  ;;  %1101 = vmatprep.subr.bf16.mxu1 %v1221_v62 }
  0x5e   : > { %951 = vmatmul.mubr.msk.f32.vlgmr.msra.gmra.mrb[0].mxu1 %vm341_vm0, %v322_v56 }
  0x5f   : > { %989 = vmatmul.mubr.msk.f32.vlgmr.msra.gmra.mrb[0].mxu0 %vm341_vm0, %v302_v57  ;;  %953 = vmatprep.mubr.msk.f32.mxu1 %vm341_vm0, %v323_v58 }
  0x60   : > { %991 = vmatprep.mubr.msk.f32.mxu0 %vm341_vm0, %v303_v59 }
  0x62   : > { %954 = vmatmul.mubr.msk.f32.gmra.mrb[2].mxu1 %vm341_vm0, %v324_v60 }
  0x63   : > { %992 = vmatmul.mubr.msk.f32.gmra.mrb[2].mxu0 %vm341_vm0, %v304_v61  ;;  %1002 = vmatprep.mubr.msk.f32.mxu1 %vm1222_vm2, %v1223_v63 }
  0x91   : > { %v639_v0 = vpop.permute.xlu0 %638  ;;  %v649_v1 = vpop.permute.xlu1 %648 }
  0x95   : > { %v644_v7 = vpop.permute.xlu0 %643  ;;  %v654_v18 = vpop.permute.xlu1 %653 }
 0x131   : > { %v952_v2 = vpop.f32.mrb[0].mxu1 }
 0x132   : > { %v990_v3 = vpop.f32.mrb[0].mxu0  ;;  %v468_v4 = vpop.f32.mrb[1].mxu1 }
 0x133   : > { %v619_v5 = vadd.f32 %v990_v3, %v952_v2  ;;  %v613_v6 = vpop.f32.mrb[1].mxu0 }
 0x134   : > { %v614_v8 = vadd.f32 %v613_v6, %v468_v4 }
 0x135   : > { %v657_v9 = vadd.f32 %v644_v7, %v619_v5  ;;  %v955_v10 = vpop.f32.mrb[2].mxu1 }
 0x136   : > { %v656_v11 = vadd.f32 %v639_v0, %v614_v8  ;;  %v993_v12 = vpop.f32.mrb[2].mxu0  ;;  %v478_v13 = vpop.f32.mrb[3].mxu1 }
 0x137   : > { %v661_v14 = vmax.f32 %v657_v9, 0.0  ;;  %v629_v15 = vadd.f32 %v993_v12, %v955_v10  ;;  %v623_v16 = vpop.f32.mrb[3].mxu0 }
 0x138   : > { %v660_v17 = vmax.f32 %v656_v11, 0.0  ;;  %v624_v19 = vadd.f32 %v623_v16, %v478_v13 }
 0x139   : > { %v659_v20 = vadd.f32 %v654_v18, %v629_v15 }
 0x13a   : > { %v1102_v21 = vpack.c.bf16 %v661_v14, %v660_v17  ;;  %v658_v22 = vadd.f32 %v649_v1, %v624_v19 }
 0x13b   : > { %v663_v23 = vmax.f32 %v659_v20, 0.0 }
 0x13c   : > { %v662_v24 = vmax.f32 %v658_v22, 0.0  ;;  %1103 = vmatpush3.bf16.msra.mxu1 %v1102_v21 }
 0x13d   : > { %1104 = vmatprep.subr.bf16.mxu1 %v1221_v62 }
 0x13e   : > { %v1105_v25 = vpack.c.bf16 %v663_v23, %v662_v24 }
 0x140   : > { %1106 = vmatpush3.bf16.msra.mxu1 %v1105_v25 }
 0x143   : > { %1003 = vmatmul.mubr.msk.f32.vlgmr.msra.gmra.mrb[4].mxu1 %vm341_vm0, %v664_v26 }
 0x216   : > { %v736_v28 = vpop.f32.mrb[4].mxu1 }
 0x217   : > { %v737_v29 = vadd.f32 %v736_v28, %v666_v27  ;;  %v1004_v30 = vpop.f32.mrb[5].mxu1 }
 0x219   : > { %740 = vst [vmem:[%s288_s21] sm:$0x1] %v737_v29 }
 0x21a   : > { %1169 = shalt.err (!%p1166_p3)
}
 0x21b   : > { %s1170_s14 = scalar_lea.hbm %s1482_s25, 16  ;;  %s1174_s18 = scalar_lea.hbm %s1531_s7, 48 }
 0x21c   : > { %p1171_p4 = scmp.ne.s32.totalorder %s1482_s25, %s1170_s14  ;;  %p1175_p9 = scmp.lt.u32.totalorder %s1482_s25, %s1531_s7 }
 0x21d   : > { %p1176_p10 = scmp.lt.u32.totalorder %s1174_s18, %s1170_s14  ;;  %p1178_p12 = scmp.lt.u32.totalorder %s1170_s14, %s1482_s25 }
 0x21e   : > { %p1172_p7 = pnand %p1171_p4, %p1303_p5 }
 0x21f   : > { %p1177_p11 = por %p1176_p10, %p1175_p9 }
 0x220   : > { %p1173_p8 = pneg %p1172_p7 }
 0x221   : > { %p1179_p13 = por %p1178_p12, %p1177_p11 }
 0x223   : > { %p1180_p0 = pnand %p1179_p13, %p1173_p8 }
 0x225   : > { %1183 = shalt.err (!%p1180_p0)
}
 0x226   : > { %1111 = dma.vmem_to_hbm [thread:$0]  (%p1303_p5), %s1484_s22, 16, %s1482_s25, %s742_s6  }
 0x227 PF: > { %p1117_p1 = scmp.ge.s32.totalorder %s1218_s29, 2  ;;  %s766_s21 = sand.u32 1, %s1206_s26  }
 0x228   : > { %s767_s23 = scalar_lea.sflag [#allocation4], %s766_s21 }
 0x229   : > { %p1114_p2 = pnand %p1117_p1, %p1307_p6 }
 0x22b   : > { %1201 = dma.done.wait (!%p1114_p2), %s767_s23, 16  }
 0x22c   : > { %1203 = vsyncadd (!%p1114_p2), %s767_s23, 4294967280  ;;  %p18_p3 = scmp.ge.s32.totalorder %s1291_s8, 5   ;;  %s1536_s26 = smov %s1210_s27 }
 0x22d   : > { %s1537_s27 = smov %s1214_s28  ;;  %s1538_s28 = smov %s1301_s11 }
 0x22e   : > { %s1539_s29 = smov %s1291_s8  ;;  %20 = sbr.rel (!%p18_p3) target bundleno = 5 (0x5), region = 86 }
 0x235   :  { %771 = vsyncpa [#allocation4], 1 }
 0x236   :  { %773 = vsyncpa [#allocation4 + $0x1], 1 }

</bundles_post_ra>
